<compile_context>
chip_gen: v7x
topology: tpu7x:2x2x1
jax: 0.10.0
libtpu: 0.0.40
codegen_flags: <defaults>
</compile_context>

<pallas_src>
import functools

import jax
import jax.numpy as jnp
from jax.experimental import pallas as pl
from jax.experimental.pallas import tpu as pltpu


# ----------------------------------------------------------------------------
# Fused kernel:
#   conv(im2col matmul) + bias + ReLU  ->  global-avg-pool with classifier
#   folded in  ->  sigmoid  ->  |pred - target| (or squared)  ->  batch mean.
# Single grid step; all intermediates stay in VMEM / vregs.
# ----------------------------------------------------------------------------
def gender_loss_kernel(patches_ref, wmat_ref, bconv_ref, wcls_ref,
                       bcls_ref, tgt_ref, loss_ref, *, hw, l2):
    # Encoder: conv lowered to one MXU matmul over all B*H*W pixel rows
    # (bf16 operands, f32 accumulation), then bias + ReLU on the VPU.
    enc = jnp.dot(patches_ref[...], wmat_ref[...],
                  preferred_element_type=jnp.float32)          # [R, C_enc] f32
    enc = jnp.maximum(enc + bconv_ref[...], 0.0)

    # Classifier folded into the global average pool:
    #   mean_hw(enc) @ w_cls == sum_hw( sum_c enc * w_cls ) / HW
    # VPU multiply + reductions instead of an N=1 MXU matmul.
    weighted = enc * wcls_ref[...]                             # [R, C_enc] f32

    batch = tgt_ref.shape[0]                                   # static (SMEM shape)
    total = jnp.zeros((1, 1), jnp.float32)
    for b in range(batch):                                     # tiny static batch
        chunk = weighted[b * hw:(b + 1) * hw, :]               # aligned sublane slice
        pooled = jnp.sum(chunk, axis=0, keepdims=True)         # [1, C_enc] (XLU)
        logit = jnp.sum(pooled, axis=1, keepdims=True) * (1.0 / hw)
        logit = logit + bcls_ref[0]                            # scalar bias (SMEM)
        pred = jax.nn.sigmoid(logit)                           # [1, 1] (EUP)
        diff = pred - tgt_ref[b]                               # target.squeeze()[b]
        total = total + (diff * diff if l2 else jnp.abs(diff))

    # avg_batch=True: mean over batch; scalar result goes straight to SMEM.
    loss_ref[0, 0] = jnp.sum(total) * (1.0 / batch)


def gender_loss_pallas(patches, w_mat, b_conv_row, w_cls_row, b_cls, target,
                       *, hw, l2=False):
    """patches: [R, K] bf16, w_mat: [K, C] bf16, b_conv_row / w_cls_row: [1, C] f32,
    b_cls: [1] f32 (SMEM), target: [B] f32 (SMEM).  Returns scalar f32 loss."""
    R, K = patches.shape
    C = w_mat.shape[1]
    kernel = functools.partial(gender_loss_kernel, hw=hw, l2=l2)
    out = pl.pallas_call(
        kernel,
        out_shape=jax.ShapeDtypeStruct((1, 1), jnp.float32),
        grid_spec=pltpu.PrefetchScalarGridSpec(
            num_scalar_prefetch=0,
            # Whole problem in one step: patches are ~36 KiB bf16, which fits
            # VMEM on every generation (v5e/v6e/v7x) with huge margin.
            grid=(1,),
            in_specs=[
                pl.BlockSpec((R, K), lambda i: (0, 0)),            # patches (VMEM)
                pl.BlockSpec((K, C), lambda i: (0, 0)),            # conv weights
                pl.BlockSpec((1, C), lambda i: (0, 0)),            # conv bias row
                pl.BlockSpec((1, C), lambda i: (0, 0)),            # classifier row
                pl.BlockSpec(memory_space=pltpu.MemorySpace.SMEM),  # b_cls  [1]
                pl.BlockSpec(memory_space=pltpu.MemorySpace.SMEM),  # target [B]
            ],
            out_specs=pl.BlockSpec(memory_space=pltpu.MemorySpace.SMEM),  # (1,1) loss
        ),
        compiler_params=pltpu.CompilerParams(
            dimension_semantics=("arbitrary",)),
    )(patches, w_mat, b_conv_row, w_cls_row, b_cls, target)
    return out[0, 0]


# ----------------------------------------------------------------------------
# Glue: parameter setup, resize, im2col (pure JAX data plumbing)
# ----------------------------------------------------------------------------
class GenderLossPallas:
    """Synthetic, structurally equivalent stand-in for GenderLoss."""

    def __init__(self, key, *, in_ch=4, enc_ch=32, imsize=16, l2=False):
        self.l2 = l2
        self.imsize = imsize
        self.in_ch = in_ch
        self.enc_ch = enc_ch
        k1, k2, k3 = jax.random.split(key, 3)
        # encoder conv: PyTorch layout [C_out, C_in, 3, 3]
        self.w_conv = jax.random.normal(k1, (enc_ch, in_ch, 3, 3),
                                        jnp.float32) * 0.1
        self.b_conv = jax.random.normal(k2, (enc_ch,), jnp.float32) * 0.01
        # classifier: Linear(enc_ch -> 1)
        self.w_cls = jax.random.normal(k3, (enc_ch, 1), jnp.float32) * 0.1
        self.b_cls = jnp.zeros((1,), jnp.float32)
        # kernel-side, matmul-ready layouts
        self.w_mat = self.w_conv.reshape(enc_ch, in_ch * 9).T.astype(jnp.bfloat16)
        self.b_conv_row = self.b_conv.reshape(1, enc_ch)            # f32
        self.w_cls_row = self.w_cls.T                                # [1, enc_ch] f32

    @staticmethod
    def _im2col(img):
        # img: NCHW -> patches [B*H*W, C*9]; tap order matches
        # w_conv.reshape(C_out, C_in*9) (inner index = c_in*9 + tap).
        B, C, H, W = img.shape
        xp = jnp.pad(img, ((0, 0), (0, 0), (1, 1), (1, 1)))
        taps = [xp[:, :, dy:dy + H, dx:dx + W]
                for dy in range(3) for dx in range(3)]               # [B, C, H, W]
        pat = jnp.stack(taps, axis=2)                                # [B, C, 9, H, W]
        pat = pat.transpose(0, 3, 4, 1, 2)                           # [B, H, W, C, 9]
        return pat.reshape(B * H * W, C * 9)

    def __call__(self, img, target_gender, avg_batch=True):
        # TODO(synk): avg_batch=False (per-sample loss vector) not implemented.
        assert avg_batch, "only avg_batch=True is implemented"
        assert target_gender.ndim == 2 and target_gender.shape[1] == 1
        B, C, H, W = img.shape
        # resize_imgs(img, self.imsize)
        # TODO(synk): jax.image.resize bilinear may differ slightly from torch
        #             F.interpolate's default half-pixel convention.
        if (H, W) != (self.imsize, self.imsize):
            img = jax.image.resize(img, (B, C, self.imsize, self.imsize),
                                   method="bilinear")
        H = W = self.imsize
        # im2col stays XLA-side (tiny at this size); bf16 halves its HBM bytes
        # and feeds the MXU directly.
        # TODO(synk): for large imsize, build the 9 taps in-kernel from the
        #             padded image (static slices / pltpu.roll) to remove the
        #             9x HBM expansion entirely.
        patches = self._im2col(img.astype(jnp.bfloat16))             # [B*H*W, C*9]
        target = target_gender.reshape(B).astype(jnp.float32)        # .squeeze()
        return gender_loss_pallas(patches, self.w_mat, self.b_conv_row,
                                  self.w_cls_row, self.b_cls, target,
                                  hw=H * W, l2=self.l2)


# ----------------------------------------------------------------------------
# Pure-JAX f32 reference (same synthetic model) for a correctness check.
# ----------------------------------------------------------------------------
def _reference_loss(module, img, target_gender):
    B, C, H, W = img.shape
    if (H, W) != (module.imsize, module.imsize):
        img = jax.image.resize(img, (B, C, module.imsize, module.imsize),
                               method="bilinear")
    patches = module._im2col(img)                                    # f32
    w_mat = module.w_conv.reshape(module.enc_ch, module.in_ch * 9).T  # f32
    enc = jnp.maximum(patches @ w_mat + module.b_conv_row, 0.0)
    enc = enc.reshape(B, module.imsize * module.imsize, module.enc_ch)
    feat = enc.mean(axis=1)                                          # [B, C_enc]
    logits = feat @ module.w_cls + module.b_cls[0]                   # [B, 1]
    pred = jax.nn.sigmoid(logits[:, 0])
    diff = pred - target_gender.reshape(B)
    per = diff * diff if module.l2 else jnp.abs(diff)
    return jnp.mean(per)


if __name__ == "__main__":
    key = jax.random.PRNGKey(0)
    k_img, k_tgt, k_par = jax.random.split(key, 3)

    B, C, H, W = 2, 4, 16, 16
    img = jax.random.normal(k_img, (B, C, H, W), jnp.float32)
    target_gender = jax.random.uniform(k_tgt, (B, 1), jnp.float32)

    module = GenderLossPallas(k_par, in_ch=C, enc_ch=32, imsize=16, l2=False)
    loss = module(img, target_gender)
    jax.block_until_ready(loss)

    ref = _reference_loss(module, img, target_gender)
    assert loss.shape == () and bool(jnp.isfinite(loss))
    assert abs(float(loss) - float(ref)) < 1e-2, (float(loss), float(ref))
    print("KERNEL_OK")
</pallas_src>

<mosaic_0001>
module attributes {stable_mosaic.version = 11 : i64} {
  func.func @gender_loss_kernel(%arg0: i32, %arg1: memref<512x36xbf16, #tpu.memory_space<vmem>>, %arg2: memref<36x32xbf16, #tpu.memory_space<vmem>>, %arg3: memref<1x32xf32, #tpu.memory_space<vmem>>, %arg4: memref<1x32xf32, #tpu.memory_space<vmem>>, %arg5: memref<1xf32, #tpu.memory_space<smem>>, %arg6: memref<2xf32, #tpu.memory_space<smem>>, %arg7: memref<1x1xf32, #tpu.memory_space<smem>>) attributes {dimension_semantics = [#tpu.dimension_semantics<arbitrary>], iteration_bounds = array<i64: 1>, scalar_prefetch = 0 : i64, scratch_operands = 0 : i64, tpu.core_type = #tpu.core_type<tc>, window_params = [{pipeline_mode = #tpu.pipeline_mode<synchronous>, transform_indices = @transform_0, window_bounds = array<i64: 512, 36>}, {pipeline_mode = #tpu.pipeline_mode<synchronous>, transform_indices = @transform_1, window_bounds = array<i64: 36, 32>}, {pipeline_mode = #tpu.pipeline_mode<synchronous>, transform_indices = @transform_2, window_bounds = array<i64: 1, 32>}, {pipeline_mode = #tpu.pipeline_mode<synchronous>, transform_indices = @transform_3, window_bounds = array<i64: 1, 32>}, {transform_indices = @transform_4, window_bounds = array<i64: 1>}, {transform_indices = @transform_5, window_bounds = array<i64: 2>}, {transform_indices = @transform_6, window_bounds = array<i64: 1, 1>}]} {
    %c0 = arith.constant 0 : index
    %c0_0 = arith.constant 0 : index
    %0 = vector.load %arg1[%c0, %c0_0] : memref<512x36xbf16, #tpu.memory_space<vmem>>, vector<512x36xbf16>
    %c0_1 = arith.constant 0 : index
    %c0_2 = arith.constant 0 : index
    %1 = vector.load %arg2[%c0_1, %c0_2] : memref<36x32xbf16, #tpu.memory_space<vmem>>, vector<36x32xbf16>
    %cst = arith.constant dense<0.000000e+00> : vector<512x32xf32>
    %2 = tpu.matmul %0, %1, %cst {dimension_numbers = #tpu.dot_dimension_numbers<[1], [0], [0], [1], [0, 0, 1, 1], [], []>} : vector<512x36xbf16>, vector<36x32xbf16>, vector<512x32xf32> -> vector<512x32xf32>
    %c0_3 = arith.constant 0 : index
    %c0_4 = arith.constant 0 : index
    %3 = vector.load %arg3[%c0_3, %c0_4] : memref<1x32xf32, #tpu.memory_space<vmem>>, vector<1x32xf32>
    %4 = vector.broadcast %3 : vector<1x32xf32> to vector<512x32xf32>
    %5 = arith.addf %2, %4 : vector<512x32xf32>
    %cst_5 = arith.constant 0.000000e+00 : f32
    %6 = vector.broadcast %cst_5 : f32 to vector<512x32xf32>
    %7 = arith.maximumf %5, %6 : vector<512x32xf32>
    %c0_6 = arith.constant 0 : index
    %c0_7 = arith.constant 0 : index
    %8 = vector.load %arg4[%c0_6, %c0_7] : memref<1x32xf32, #tpu.memory_space<vmem>>, vector<1x32xf32>
    %9 = vector.broadcast %8 : vector<1x32xf32> to vector<512x32xf32>
    %10 = arith.mulf %7, %9 : vector<512x32xf32>
    %cst_8 = arith.constant 0.000000e+00 : f32
    %11 = vector.broadcast %cst_8 : f32 to vector<1x1xf32>
    %12 = vector.extract_strided_slice %10 {offsets = [0, 0], sizes = [256, 32], strides = [1, 1]} : vector<512x32xf32> to vector<256x32xf32>
    %cst_9 = arith.constant dense<0.000000e+00> : vector<32xf32>
    %13 = vector.multi_reduction <add>, %12, %cst_9 [0] : vector<256x32xf32> to vector<32xf32>
    %14 = vector.shape_cast %13 : vector<32xf32> to vector<1x32xf32>
    %cst_10 = arith.constant dense<0.000000e+00> : vector<1xf32>
    %15 = vector.multi_reduction <add>, %14, %cst_10 [1] : vector<1x32xf32> to vector<1xf32>
    %16 = vector.shape_cast %15 : vector<1xf32> to vector<1x1xf32>
    %cst_11 = arith.constant 3.906250e-03 : f32
    %17 = vector.broadcast %cst_11 : f32 to vector<1x1xf32>
    %18 = arith.mulf %16, %17 : vector<1x1xf32>
    %c0_12 = arith.constant 0 : index
    %19 = memref.load %arg5[%c0_12] : memref<1xf32, #tpu.memory_space<smem>>
    %20 = vector.broadcast %19 : f32 to vector<1x1xf32>
    %21 = arith.addf %18, %20 : vector<1x1xf32>
    %22 = arith.negf %21 : vector<1x1xf32>
    %23 = math.exp %22 : vector<1x1xf32>
    %cst_13 = arith.constant 1.000000e+00 : f32
    %24 = vector.broadcast %cst_13 : f32 to vector<1x1xf32>
    %25 = arith.addf %24, %23 : vector<1x1xf32>
    %26 = arith.divf %24, %25 : vector<1x1xf32>
    %c0_14 = arith.constant 0 : index
    %27 = memref.load %arg6[%c0_14] : memref<2xf32, #tpu.memory_space<smem>>
    %28 = vector.broadcast %27 : f32 to vector<1x1xf32>
    %29 = arith.subf %26, %28 : vector<1x1xf32>
    %30 = math.absf %29 : vector<1x1xf32>
    %31 = arith.addf %11, %30 : vector<1x1xf32>
    %32 = vector.extract_strided_slice %10 {offsets = [256, 0], sizes = [256, 32], strides = [1, 1]} : vector<512x32xf32> to vector<256x32xf32>
    %cst_15 = arith.constant dense<0.000000e+00> : vector<32xf32>
    %33 = vector.multi_reduction <add>, %32, %cst_15 [0] : vector<256x32xf32> to vector<32xf32>
    %34 = vector.shape_cast %33 : vector<32xf32> to vector<1x32xf32>
    %cst_16 = arith.constant dense<0.000000e+00> : vector<1xf32>
    %35 = vector.multi_reduction <add>, %34, %cst_16 [1] : vector<1x32xf32> to vector<1xf32>
    %36 = vector.shape_cast %35 : vector<1xf32> to vector<1x1xf32>
    %cst_17 = arith.constant 3.906250e-03 : f32
    %37 = vector.broadcast %cst_17 : f32 to vector<1x1xf32>
    %38 = arith.mulf %36, %37 : vector<1x1xf32>
    %c0_18 = arith.constant 0 : index
    %39 = memref.load %arg5[%c0_18] : memref<1xf32, #tpu.memory_space<smem>>
    %40 = vector.broadcast %39 : f32 to vector<1x1xf32>
    %41 = arith.addf %38, %40 : vector<1x1xf32>
    %42 = arith.negf %41 : vector<1x1xf32>
    %43 = math.exp %42 : vector<1x1xf32>
    %cst_19 = arith.constant 1.000000e+00 : f32
    %44 = vector.broadcast %cst_19 : f32 to vector<1x1xf32>
    %45 = arith.addf %44, %43 : vector<1x1xf32>
    %46 = arith.divf %44, %45 : vector<1x1xf32>
    %c1 = arith.constant 1 : index
    %47 = memref.load %arg6[%c1] : memref<2xf32, #tpu.memory_space<smem>>
    %48 = vector.broadcast %47 : f32 to vector<1x1xf32>
    %49 = arith.subf %46, %48 : vector<1x1xf32>
    %50 = math.absf %49 : vector<1x1xf32>
    %51 = arith.addf %31, %50 : vector<1x1xf32>
    %52 = vector.shape_cast %51 : vector<1x1xf32> to vector<1x1x1xf32>
    %cst_20 = arith.constant dense<0.000000e+00> : vector<1xf32>
    %53 = vector.multi_reduction <add>, %52, %cst_20 [1, 2] : vector<1x1x1xf32> to vector<1xf32>
    %54 = vector.shape_cast %53 : vector<1xf32> to vector<1x1x1xf32>
    %55 = vector.extract %54[0, 0, 0] : f32 from vector<1x1x1xf32>
    %cst_21 = arith.constant 5.000000e-01 : f32
    %56 = arith.mulf %55, %cst_21 : f32
    %c0_22 = arith.constant 0 : index
    %c0_23 = arith.constant 0 : index
    %57 = memref.load %arg7[%c0_22, %c0_23] : memref<1x1xf32, #tpu.memory_space<smem>>
    memref.store %56, %arg7[%c0_22, %c0_23] : memref<1x1xf32, #tpu.memory_space<smem>>
    return
  }
  func.func @transform_0(%arg0: i32) -> (i32, i32) {
    %c0_i32 = arith.constant 0 : i32
    %c0_i32_0 = arith.constant 0 : i32
    %c0_i32_1 = arith.constant 0 : i32
    return %c0_i32, %c0_i32_0 : i32, i32
  }
  func.func @transform_1(%arg0: i32) -> (i32, i32) {
    %c0_i32 = arith.constant 0 : i32
    %c0_i32_0 = arith.constant 0 : i32
    %c0_i32_1 = arith.constant 0 : i32
    return %c0_i32, %c0_i32_0 : i32, i32
  }
  func.func @transform_2(%arg0: i32) -> (i32, i32) {
    %c0_i32 = arith.constant 0 : i32
    %c0_i32_0 = arith.constant 0 : i32
    %c0_i32_1 = arith.constant 0 : i32
    return %c0_i32, %c0_i32_0 : i32, i32
  }
  func.func @transform_3(%arg0: i32) -> (i32, i32) {
    %c0_i32 = arith.constant 0 : i32
    %c0_i32_0 = arith.constant 0 : i32
    %c0_i32_1 = arith.constant 0 : i32
    return %c0_i32, %c0_i32_0 : i32, i32
  }
  func.func @transform_4(%arg0: i32) -> i32 {
    %c0_i32 = arith.constant 0 : i32
    %c0_i32_0 = arith.constant 0 : i32
    return %c0_i32 : i32
  }
  func.func @transform_5(%arg0: i32) -> i32 {
    %c0_i32 = arith.constant 0 : i32
    %c0_i32_0 = arith.constant 0 : i32
    return %c0_i32 : i32
  }
  func.func @transform_6(%arg0: i32) -> (i32, i32) {
    %c0_i32 = arith.constant 0 : i32
    %c0_i32_0 = arith.constant 0 : i32
    %c0_i32_1 = arith.constant 0 : i32
    return %c0_i32, %c0_i32_0 : i32, i32
  }
}

</mosaic_0001>

<bundles_post_ra>
// kernel: tpu_custom_call.1
= control target key start
LH: loop header
LB: loop body
LE: loop exit
PB: predicated region body
PF: predicated region fallthrough
CT: control target
= control target key end

     0   :  { %12 = vsyncpa [#allocation5], 0  ;;  %s1679_s0 = inlined_call_operand.vmem [shape: bf16[512,36], index: 0, kind: input, shape index: {}]   ;;  %s1680_s1 = inlined_call_operand.vmem [shape: bf16[36,32], index: 1, kind: input, shape index: {}]   ;;  %s1681_s2 = inlined_call_operand.vmem [shape: f32[1,32], index: 2, kind: input, shape index: {}]   ;;  %s1682_s3 = inlined_call_operand.vmem [shape: f32[1,32], index: 3, kind: input, shape index: {}]   ;;  %s1683_s4 = inlined_call_operand.<no memory space> [shape: f32[1], index: 4, kind: input, shape index: {}]   ;;  %s1684_s5 = inlined_call_operand.vmem [shape: f32[2], index: 5, kind: input, shape index: {}]   ;;  %s1685_s6 = inlined_call_operand.hbm [shape: f32[1,1], index: 6, kind: output, shape index: {}]  }
   0x1   :  { %13 = vsyncpa [#allocation4], 0  ;;  %s30_s23 = sshll.u32 %s1684_s5, 4  ;;  %s31_s23 = int_to_ptr.vmem [resolvable:$true] %s30_s23 }
   0x2   :  { %s1239_s24 = scalar_lea.vmem %s31_s23, 16  ;;  %p1244_p1 = scmp.lt.s32.totalorder %s31_s23, %s31_s23 }
   0x3   :  { %p1240_p0 = scmp.ne.s32.totalorder %s31_s23, %s1239_s24  ;;  %p1245_p2 = scmp.lt.s32.totalorder %s1239_s24, %s1239_s24 }
   0x5   :  { %p1246_p3 = por %p1245_p2, %p1244_p1 }
   0x7   :  { %p1247_p4 = pnand %p1246_p3, %p1240_p0 }
   0x9   :  { %1250 = shalt.err (!%p1247_p4)
}
   0xa   :  { %s1265_s25 = smov [#allocation3]  }
   0xb   :  { %33 = dma.vmem_to_smem %s31_s23, 16, %s1265_s25, [#allocation5]  }
   0xc   :  { %1261 = dma.done.wait [#allocation5], 16  }
   0xd   :  { %1262 = vsyncadd [#allocation5], 4294967280 }
   0xe   :  { %37 = sfence }
   0xf   :  { %v1196_v0 = vld [vmem:[%s1680_s1] sm:$0xff]   ;;  %v1197_v1 = vld [vmem:[%s1680_s1 + $0x8] sm:$0xff]   ;;  %vm290_vm0 = vcmask 293888   ;;  %v1198_v2 = vld [vmem:[%s1680_s1 + $0x10] ss:$0 sps:$4 sm:$0x33]  }
  0x10   :  { %1114 = vmatprep.subr.bf16.mxu0 %v1196_v0  ;;  %1184 = vmatprep.subr.bf16.mxu1 %v1196_v0  ;;  %v1199_v3 = vld [vmem:[%s1679_s0] sm:$0xff]   ;;  %vm387_vm1 = vcmask 1041408   ;;  %v1201_v6 = vld [vmem:[%s1679_s0 + $0x8] sm:$0xff]   ;;  %v1203_v8 = vld [vmem:[%s1679_s0 + $0x10] sm:$0xff]   ;;  %vm815_vm2 = vcmask 261120   ;;  %s1078_s22 = sld [smem:[#allocation3 + $0x1]] }
  0x11   :  { %1115 = vmatpush3.bf16.msra.mxu0 %v1196_v0  ;;  %1187 = vmatpush3.bf16.msra.mxu1 %v1196_v0  ;;  %v1200_v4 = vld [vmem:[%s1679_s0 + $0x80] sm:$0xff]   ;;  %v389_v5 = vsel %vm387_vm1, %v1198_v2, 0  ;;  %v1202_v7 = vld [vmem:[%s1679_s0 + $0x88] sm:$0xff]   ;;  %v1204_v9 = vld [vmem:[%s1679_s0 + $0x90] sm:$0xff]   ;;  %s1251_s26 = scalar_lea.hbm %s1685_s6, 16 }
  0x12   :  { %1116 = vmatprep.subr.bf16.mxu0 %v1197_v1  ;;  %1185 = vmatprep.subr.bf16.mxu1 %v1197_v1  ;;  %v1205_v10 = vld [vmem:[%s1679_s0 + $0x18] sm:$0xff]   ;;  %v1207_v12 = vld [vmem:[%s1679_s0 + $0x20] sm:$0xff]   ;;  %v1209_v14 = vld [vmem:[%s1679_s0 + $0x28] sm:$0xff]   ;;  %p1252_p5 = scmp.ne.s32.totalorder %s1685_s6, %s1251_s26  ;;  %p1255_p6 = scmp.lt.u32.totalorder %s1251_s26, %s1685_s6 }
  0x13   :  { %1120 = vmatprep.mubr.msk.bf16.mxu0 %vm290_vm0, %v1199_v3  ;;  %1152 = vmatprep.mubr.msk.bf16.mxu1 %vm290_vm0, %v1200_v4  ;;  %v1206_v11 = vld [vmem:[%s1679_s0 + $0x98] sm:$0xff]   ;;  %v1208_v13 = vld [vmem:[%s1679_s0 + $0xa0] sm:$0xff]   ;;  %v1210_v15 = vld [vmem:[%s1679_s0 + $0xa8] sm:$0xff]  }
  0x14   :  { %v1211_v16 = vld [vmem:[%s1679_s0 + $0x30] sm:$0xff]   ;;  %v1213_v18 = vld [vmem:[%s1679_s0 + $0x38] sm:$0xff]   ;;  %v1215_v20 = vld [vmem:[%s1679_s0 + $0x40] sm:$0xff]   ;;  %p1257_p7 = pnand %p1255_p6, %p1252_p5 }
  0x15   :  { %1117 = vmatpush3.bf16.msra.mxu0 %v1197_v1  ;;  %1188 = vmatpush3.bf16.msra.mxu1 %v1197_v1  ;;  %v1212_v17 = vld [vmem:[%s1679_s0 + $0xb0] sm:$0xff]   ;;  %v1214_v19 = vld [vmem:[%s1679_s0 + $0xb8] sm:$0xff]   ;;  %v1216_v21 = vld [vmem:[%s1679_s0 + $0xc0] sm:$0xff]  }
  0x16   :  { %1190 = vmatprep.subr.msk.bf16.mxu0 %vm387_vm1, %v1198_v2  ;;  %1191 = vmatprep.subr.msk.bf16.mxu1 %vm387_vm1, %v1198_v2  ;;  %v1217_v22 = vld [vmem:[%s1679_s0 + $0x48] sm:$0xff]   ;;  %v1219_v24 = vld [vmem:[%s1679_s0 + $0x50] sm:$0xff]   ;;  %v1221_v26 = vld [vmem:[%s1679_s0 + $0x58] sm:$0xff]  }
  0x17   :  { %v1218_v23 = vld [vmem:[%s1679_s0 + $0xc8] sm:$0xff]   ;;  %v1220_v25 = vld [vmem:[%s1679_s0 + $0xd0] sm:$0xff]   ;;  %v1222_v27 = vld [vmem:[%s1679_s0 + $0xd8] sm:$0xff]  }
  0x18   :  { %v1223_v28 = vld [vmem:[%s1679_s0 + $0x60] sm:$0xff]   ;;  %v1225_v30 = vld [vmem:[%s1679_s0 + $0x68] sm:$0xff]   ;;  %v1227_v32 = vld [vmem:[%s1679_s0 + $0x70] sm:$0xff]  }
  0x19   :  { %1119 = vmatpush3.bf16.msra.mxu0 %v389_v5  ;;  %1189 = vmatpush3.bf16.msra.mxu1 %v389_v5  ;;  %v1224_v29 = vld [vmem:[%s1679_s0 + $0xe0] sm:$0xff]   ;;  %v1226_v31 = vld [vmem:[%s1679_s0 + $0xe8] sm:$0xff]   ;;  %v1228_v33 = vld [vmem:[%s1679_s0 + $0xf0] sm:$0xff]  }
  0x1a   :  { %v1229_v34 = vld [vmem:[%s1679_s0 + $0x78] sm:$0xff]   ;;  %v1445_v36 = vld [vmem:[%s1681_s2] ss:$0 sm:$0xff] }
  0x1b   :  { %v1230_v35 = vld [vmem:[%s1679_s0 + $0xf8] sm:$0xff]   ;;  %v1452_v43 = vld [vmem:[%s1682_s3] ss:$0 sm:$0xff]  ;;  %s898_s3 = sld [smem:[#allocation3]] }
  0x1c   :  { %1121 = vmatmul.mubr.msk.bf16.vlgmr.msra.gmra.mrb[0].mxu0 %vm290_vm0, %v1201_v6  ;;  %1153 = vmatmul.mubr.msk.bf16.vlgmr.msra.gmra.mrb[0].mxu1 %vm290_vm0, %v1202_v7 }
  0x1d   :  { %1124 = vmatprep.mubr.msk.bf16.mxu0 %vm290_vm0, %v1203_v8  ;;  %1156 = vmatprep.mubr.msk.bf16.mxu1 %vm290_vm0, %v1204_v9 }
  0x24   :  { %1125 = vmatmul.mubr.msk.bf16.gmra.mrb[4].mxu0 %vm290_vm0, %v1205_v10  ;;  %1157 = vmatmul.mubr.msk.bf16.gmra.mrb[4].mxu1 %vm290_vm0, %v1206_v11 }
  0x25   :  { %1128 = vmatprep.mubr.msk.bf16.mxu0 %vm290_vm0, %v1207_v12  ;;  %1160 = vmatprep.mubr.msk.bf16.mxu1 %vm290_vm0, %v1208_v13 }
  0x2c   :  { %1129 = vmatmul.mubr.msk.bf16.gmra.mrb[8].mxu0 %vm290_vm0, %v1209_v14  ;;  %1161 = vmatmul.mubr.msk.bf16.gmra.mrb[8].mxu1 %vm290_vm0, %v1210_v15 }
  0x2d   :  { %1132 = vmatprep.mubr.msk.bf16.mxu0 %vm290_vm0, %v1211_v16  ;;  %1164 = vmatprep.mubr.msk.bf16.mxu1 %vm290_vm0, %v1212_v17 }
  0x34   :  { %1133 = vmatmul.mubr.msk.bf16.gmra.mrb[12].mxu0 %vm290_vm0, %v1213_v18  ;;  %1165 = vmatmul.mubr.msk.bf16.gmra.mrb[12].mxu1 %vm290_vm0, %v1214_v19 }
  0x35   :  { %1136 = vmatprep.mubr.msk.bf16.mxu0 %vm290_vm0, %v1215_v20  ;;  %1168 = vmatprep.mubr.msk.bf16.mxu1 %vm290_vm0, %v1216_v21 }
  0x3c   :  { %1137 = vmatmul.mubr.msk.bf16.gmra.mrb[16].mxu0 %vm290_vm0, %v1217_v22  ;;  %1169 = vmatmul.mubr.msk.bf16.gmra.mrb[16].mxu1 %vm290_vm0, %v1218_v23 }
  0x3d   :  { %1140 = vmatprep.mubr.msk.bf16.mxu0 %vm290_vm0, %v1219_v24  ;;  %1172 = vmatprep.mubr.msk.bf16.mxu1 %vm290_vm0, %v1220_v25 }
  0x44   :  { %1141 = vmatmul.mubr.msk.bf16.gmra.mrb[20].mxu0 %vm290_vm0, %v1221_v26  ;;  %1173 = vmatmul.mubr.msk.bf16.gmra.mrb[20].mxu1 %vm290_vm0, %v1222_v27 }
  0x45   :  { %1144 = vmatprep.mubr.msk.bf16.mxu0 %vm290_vm0, %v1223_v28  ;;  %1176 = vmatprep.mubr.msk.bf16.mxu1 %vm290_vm0, %v1224_v29 }
  0x4c   :  { %1145 = vmatmul.mubr.msk.bf16.gmra.mrb[24].mxu0 %vm290_vm0, %v1225_v30  ;;  %1177 = vmatmul.mubr.msk.bf16.gmra.mrb[24].mxu1 %vm290_vm0, %v1226_v31 }
  0x4d   :  { %1148 = vmatprep.mubr.msk.bf16.mxu0 %vm290_vm0, %v1227_v32  ;;  %1180 = vmatprep.mubr.msk.bf16.mxu1 %vm290_vm0, %v1228_v33 }
  0x54   :  { %1149 = vmatmul.mubr.msk.bf16.gmra.mrb[28].mxu0 %vm290_vm0, %v1229_v34  ;;  %1181 = vmatmul.mubr.msk.bf16.gmra.mrb[28].mxu1 %vm290_vm0, %v1230_v35 }
  0xef   :  { %v1122_v37 = vpop.f32.mrb[0].mxu0  ;;  %v1154_v38 = vpop.f32.mrb[0].mxu1 }
  0xf0   :  { %v434_v39 = vadd.f32 %v1122_v37, %v1445_v36  ;;  %v562_v40 = vadd.f32 %v1154_v38, %v1445_v36  ;;  %v425_v41 = vpop.f32.mrb[1].mxu0  ;;  %v553_v42 = vpop.f32.mrb[1].mxu1 }
  0xf1   :  { %v426_v44 = vadd.f32 %v1445_v36, %v425_v41  ;;  %v554_v45 = vadd.f32 %v1445_v36, %v553_v42  ;;  %v1123_v46 = vpop.f32.mrb[2].mxu0  ;;  %v1155_v47 = vpop.f32.mrb[2].mxu1 }
  0xf2   :  { %v682_v48 = vmax.f32 %v434_v39, 0.0  ;;  %v714_v49 = vmax.f32 %v562_v40, 0.0  ;;  %v437_v50 = vadd.f32 %v1123_v46, %v1445_v36  ;;  %v565_v51 = vadd.f32 %v1155_v47, %v1445_v36  ;;  %v428_v52 = vpop.f32.mrb[3].mxu0  ;;  %v556_v53 = vpop.f32.mrb[3].mxu1 }
  0xf3   :  { %v680_v54 = vmax.f32 %v426_v44, 0.0  ;;  %v712_v55 = vmax.f32 %v554_v45, 0.0  ;;  %v429_v56 = vadd.f32 %v1445_v36, %v428_v52  ;;  %v557_v57 = vadd.f32 %v1445_v36, %v556_v53 }
  0xf4   :  { %v753_v58 = vmul.f32 %v1452_v43, %v682_v48  ;;  %v785_v59 = vmul.f32 %v1452_v43, %v714_v49  ;;  %v683_v60 = vmax.f32 %v437_v50, 0.0  ;;  %v715_v61 = vmax.f32 %v565_v51, 0.0 }
  0xf5   :  { %v751_v62 = vmul.f32 %v1452_v43, %v680_v54  ;;  %v783_v63 = vmul.f32 %v1452_v43, %v712_v55  ;;  %v681_v0 = vmax.f32 %v429_v56, 0.0  ;;  %v713_v1 = vmax.f32 %v557_v57, 0.0 }
  0xf6   :  { %v819_v2 = vsel %vm815_vm2, %v753_v58, 0.0  ;;  %v906_v3 = vsel %vm815_vm2, %v785_v59, 0.0  ;;  %v754_v4 = vmul.f32 %v1452_v43, %v683_v60  ;;  %v786_v6 = vmul.f32 %v1452_v43, %v715_v61 }
  0xf7   :  { %v903_v5 = vsel %vm815_vm2, %v783_v63, 0.0  ;;  %v752_v7 = vmul.f32 %v1452_v43, %v681_v0  ;;  %v784_v8 = vmul.f32 %v1452_v43, %v713_v1  ;;  %v1126_v9 = vpop.f32.mrb[4].mxu0  ;;  %v1158_v10 = vpop.f32.mrb[4].mxu1  ;;  %v816_v11 = vsel %vm815_vm2, %v751_v62, 0.0 }
  0xf8   :  { %v821_v12 = vsel %vm815_vm2, %v754_v4, 0.0  ;;  %v450_v13 = vadd.f32 %v1126_v9, %v1445_v36  ;;  %v578_v14 = vadd.f32 %v1158_v10, %v1445_v36  ;;  %v441_v15 = vpop.f32.mrb[5].mxu0  ;;  %v569_v16 = vpop.f32.mrb[5].mxu1  ;;  %v908_v33 = vsel %vm815_vm2, %v786_v6, 0.0 }
  0xf9   :  { %v817_v17 = vsel %vm815_vm2, %v752_v7, 0.0  ;;  %v904_v18 = vsel %vm815_vm2, %v784_v8, 0.0  ;;  %v442_v19 = vadd.f32 %v1445_v36, %v441_v15  ;;  %v570_v20 = vadd.f32 %v1445_v36, %v569_v16  ;;  %v1127_v21 = vpop.f32.mrb[6].mxu0  ;;  %v1159_v22 = vpop.f32.mrb[6].mxu1 }
  0xfa   :  { %v818_v23 = vadd.f32 %v817_v17, %v816_v11  ;;  %v905_v24 = vadd.f32 %v904_v18, %v903_v5  ;;  %v686_v25 = vmax.f32 %v450_v13, 0.0  ;;  %v718_v26 = vmax.f32 %v578_v14, 0.0  ;;  %v444_v27 = vpop.f32.mrb[7].mxu0  ;;  %v572_v28 = vpop.f32.mrb[7].mxu1 }
  0xfb   :  { %v684_v29 = vmax.f32 %v442_v19, 0.0  ;;  %v716_v30 = vmax.f32 %v570_v20, 0.0  ;;  %v453_v31 = vadd.f32 %v1127_v21, %v1445_v36  ;;  %v581_v32 = vadd.f32 %v1159_v22, %v1445_v36 }
  0xfc   :  { %v820_v34 = vadd.f32 %v819_v2, %v818_v23  ;;  %v907_v35 = vadd.f32 %v906_v3, %v905_v24  ;;  %v757_v37 = vmul.f32 %v1452_v43, %v686_v25  ;;  %v789_v46 = vmul.f32 %v1452_v43, %v718_v26 }
  0xfd   :  { %v755_v38 = vmul.f32 %v1452_v43, %v684_v29  ;;  %v787_v39 = vmul.f32 %v1452_v43, %v716_v30  ;;  %v687_v40 = vmax.f32 %v453_v31, 0.0  ;;  %v719_v41 = vmax.f32 %v581_v32, 0.0 }
  0xfe   :  { %v822_v42 = vadd.f32 %v821_v12, %v820_v34  ;;  %v909_v44 = vadd.f32 %v908_v33, %v907_v35  ;;  %v827_v45 = vsel %vm815_vm2, %v757_v37, 0.0  ;;  %v445_v53 = vadd.f32 %v1445_v36, %v444_v27 }
  0xff   :  { %v823_v47 = vsel %vm815_vm2, %v755_v38, 0.0  ;;  %v910_v48 = vsel %vm815_vm2, %v787_v39, 0.0  ;;  %v1130_v49 = vpop.f32.mrb[8].mxu0  ;;  %v1162_v50 = vpop.f32.mrb[8].mxu1  ;;  %v573_v54 = vadd.f32 %v1445_v36, %v572_v28  ;;  %v758_v57 = vmul.f32 %v1452_v43, %v687_v40 }
 0x100   :  { %v824_v51 = vadd.f32 %v823_v47, %v822_v42  ;;  %v911_v52 = vadd.f32 %v910_v48, %v909_v44  ;;  %v457_v55 = vpop.f32.mrb[9].mxu0  ;;  %v585_v56 = vpop.f32.mrb[9].mxu1  ;;  %v790_v58 = vmul.f32 %v1452_v43, %v719_v41  ;;  %v466_v59 = vadd.f32 %v1130_v49, %v1445_v36 }
 0x101   :  { %v594_v60 = vadd.f32 %v1162_v50, %v1445_v36  ;;  %v1131_v61 = vpop.f32.mrb[10].mxu0  ;;  %v1163_v62 = vpop.f32.mrb[10].mxu1  ;;  %v685_v63 = vmax.f32 %v445_v53, 0.0  ;;  %v717_v0 = vmax.f32 %v573_v54, 0.0  ;;  %v458_v1 = vadd.f32 %v1445_v36, %v457_v55 }
 0x102   :  { %v586_v2 = vadd.f32 %v1445_v36, %v585_v56  ;;  %v460_v3 = vpop.f32.mrb[11].mxu0  ;;  %v588_v4 = vpop.f32.mrb[11].mxu1  ;;  %v690_v5 = vmax.f32 %v466_v59, 0.0  ;;  %v469_v7 = vadd.f32 %v1131_v61, %v1445_v36  ;;  %v597_v8 = vadd.f32 %v1163_v62, %v1445_v36 }
 0x103   :  { %v722_v6 = vmax.f32 %v594_v60, 0.0  ;;  %v756_v9 = vmul.f32 %v1452_v43, %v685_v63  ;;  %v788_v10 = vmul.f32 %v1452_v43, %v717_v0  ;;  %v688_v11 = vmax.f32 %v458_v1, 0.0 }
 0x104   :  { %v720_v12 = vmax.f32 %v586_v2, 0.0  ;;  %v914_v13 = vsel %vm815_vm2, %v789_v46, 0.0  ;;  %v761_v14 = vmul.f32 %v1452_v43, %v690_v5  ;;  %v691_v16 = vmax.f32 %v469_v7, 0.0 }
 0x105   :  { %v793_v15 = vmul.f32 %v1452_v43, %v722_v6  ;;  %v825_v17 = vsel %vm815_vm2, %v756_v9, 0.0  ;;  %v912_v18 = vsel %vm815_vm2, %v788_v10, 0.0  ;;  %v759_v19 = vmul.f32 %v1452_v43, %v688_v11 }
 0x106   :  { %v791_v20 = vmul.f32 %v1452_v43, %v720_v12  ;;  %v829_v21 = vsel %vm815_vm2, %v758_v57, 0.0  ;;  %v916_v22 = vsel %vm815_vm2, %v790_v58, 0.0  ;;  %v826_v23 = vadd.f32 %v825_v17, %v824_v51 }
 0x107   :  { %v913_v24 = vadd.f32 %v912_v18, %v911_v52  ;;  %v1134_v25 = vpop.f32.mrb[12].mxu0  ;;  %v1166_v26 = vpop.f32.mrb[12].mxu1  ;;  %v835_v27 = vsel %vm815_vm2, %v761_v14, 0.0  ;;  %v922_v28 = vsel %vm815_vm2, %v793_v15, 0.0  ;;  %v831_v29 = vsel %vm815_vm2, %v759_v19, 0.0 }
 0x108   :  { %v723_v30 = vmax.f32 %v597_v8, 0.0  ;;  %v473_v31 = vpop.f32.mrb[13].mxu0  ;;  %v601_v32 = vpop.f32.mrb[13].mxu1  ;;  %v828_v33 = vadd.f32 %v827_v45, %v826_v23  ;;  %v461_v35 = vadd.f32 %v1445_v36, %v460_v3  ;;  %v589_v37 = vadd.f32 %v1445_v36, %v588_v4 }
 0x109   :  { %v915_v34 = vadd.f32 %v914_v13, %v913_v24  ;;  %v1135_v38 = vpop.f32.mrb[14].mxu0  ;;  %v1167_v39 = vpop.f32.mrb[14].mxu1  ;;  %v918_v40 = vsel %vm815_vm2, %v791_v20, 0.0  ;;  %v762_v41 = vmul.f32 %v1452_v43, %v691_v16  ;;  %v482_v42 = vadd.f32 %v1134_v25, %v1445_v36 }
 0x10a   :  { %v610_v44 = vadd.f32 %v1166_v26, %v1445_v36  ;;  %v476_v46 = vpop.f32.mrb[15].mxu0  ;;  %v604_v47 = vpop.f32.mrb[15].mxu1  ;;  %v830_v48 = vadd.f32 %v829_v21, %v828_v33  ;;  %v689_v45 = vmax.f32 %v461_v35, 0.0  ;;  %v721_v50 = vmax.f32 %v589_v37, 0.0 }
 0x10b   :  { %v917_v49 = vadd.f32 %v916_v22, %v915_v34  ;;  %v794_v51 = vmul.f32 %v1452_v43, %v723_v30  ;;  %v474_v53 = vadd.f32 %v1445_v36, %v473_v31  ;;  %v602_v54 = vadd.f32 %v1445_v36, %v601_v32 }
 0x10c   :  { %v726_v52 = vmax.f32 %v610_v44, 0.0  ;;  %v832_v55 = vadd.f32 %v831_v29, %v830_v48  ;;  %v760_v57 = vmul.f32 %v1452_v43, %v689_v45  ;;  %v792_v58 = vmul.f32 %v1452_v43, %v721_v50 }
 0x10d   :  { %v919_v56 = vadd.f32 %v918_v40, %v917_v49  ;;  %v694_v59 = vmax.f32 %v482_v42, 0.0  ;;  %v692_v61 = vmax.f32 %v474_v53, 0.0  ;;  %v724_v62 = vmax.f32 %v602_v54, 0.0 }
 0x10e   :  { %v797_v60 = vmul.f32 %v1452_v43, %v726_v52  ;;  %v833_v63 = vsel %vm815_vm2, %v760_v57, 0.0  ;;  %v920_v0 = vsel %vm815_vm2, %v792_v58, 0.0  ;;  %v485_v1 = vadd.f32 %v1135_v38, %v1445_v36 }
 0x10f   :  { %v613_v2 = vadd.f32 %v1167_v39, %v1445_v36  ;;  %v1138_v3 = vpop.f32.mrb[16].mxu0  ;;  %v1170_v4 = vpop.f32.mrb[16].mxu1  ;;  %v837_v5 = vsel %vm815_vm2, %v762_v41, 0.0  ;;  %v924_v6 = vsel %vm815_vm2, %v794_v51, 0.0  ;;  %v834_v7 = vadd.f32 %v833_v63, %v832_v55 }
 0x110   :  { %v921_v8 = vadd.f32 %v920_v0, %v919_v56  ;;  %v489_v9 = vpop.f32.mrb[17].mxu0  ;;  %v617_v10 = vpop.f32.mrb[17].mxu1  ;;  %v763_v11 = vmul.f32 %v1452_v43, %v692_v61  ;;  %v795_v12 = vmul.f32 %v1452_v43, %v724_v62  ;;  %v695_v13 = vmax.f32 %v485_v1, 0.0 }
 0x111   :  { %v727_v14 = vmax.f32 %v613_v2, 0.0  ;;  %v1139_v15 = vpop.f32.mrb[18].mxu0  ;;  %v1171_v16 = vpop.f32.mrb[18].mxu1  ;;  %v836_v17 = vadd.f32 %v835_v27, %v834_v7  ;;  %v477_v19 = vadd.f32 %v1445_v36, %v476_v46  ;;  %v605_v20 = vadd.f32 %v1445_v36, %v604_v47 }
 0x112   :  { %v923_v18 = vadd.f32 %v922_v28, %v921_v8  ;;  %v492_v21 = vpop.f32.mrb[19].mxu0  ;;  %v620_v22 = vpop.f32.mrb[19].mxu1  ;;  %v765_v23 = vmul.f32 %v1452_v43, %v694_v59  ;;  %v930_v24 = vsel %vm815_vm2, %v797_v60, 0.0  ;;  %v839_v25 = vsel %vm815_vm2, %v763_v11, 0.0 }
 0x113   :  { %v926_v26 = vsel %vm815_vm2, %v795_v12, 0.0  ;;  %v838_v29 = vadd.f32 %v837_v5, %v836_v17  ;;  %v693_v31 = vmax.f32 %v477_v19, 0.0  ;;  %v725_v32 = vmax.f32 %v605_v20, 0.0 }
 0x114   :  { %v925_v30 = vadd.f32 %v924_v6, %v923_v18  ;;  %v766_v27 = vmul.f32 %v1452_v43, %v695_v13  ;;  %v798_v28 = vmul.f32 %v1452_v43, %v727_v14  ;;  %v498_v33 = vadd.f32 %v1138_v3, %v1445_v36 }
 0x115   :  { %v626_v34 = vadd.f32 %v1170_v4, %v1445_v36  ;;  %v840_v35 = vadd.f32 %v839_v25, %v838_v29  ;;  %v764_v38 = vmul.f32 %v1452_v43, %v693_v31  ;;  %v796_v39 = vmul.f32 %v1452_v43, %v725_v32 }
 0x116   :  { %v927_v37 = vadd.f32 %v926_v26, %v925_v30  ;;  %v698_v40 = vmax.f32 %v498_v33, 0.0  ;;  %v490_v42 = vadd.f32 %v1445_v36, %v489_v9  ;;  %v618_v44 = vadd.f32 %v1445_v36, %v617_v10 }
 0x117   :  { %v730_v41 = vmax.f32 %v626_v34, 0.0  ;;  %v1142_v46 = vpop.f32.mrb[20].mxu0  ;;  %v1174_v47 = vpop.f32.mrb[20].mxu1  ;;  %v841_v48 = vsel %vm815_vm2, %v764_v38, 0.0  ;;  %v928_v49 = vsel %vm815_vm2, %v796_v39, 0.0  ;;  %v501_v45 = vadd.f32 %v1139_v15, %v1445_v36 }
 0x118   :  { %v629_v50 = vadd.f32 %v1171_v16, %v1445_v36  ;;  %v505_v51 = vpop.f32.mrb[21].mxu0  ;;  %v633_v52 = vpop.f32.mrb[21].mxu1  ;;  %v843_v53 = vsel %vm815_vm2, %v765_v23, 0.0  ;;  %v842_v54 = vadd.f32 %v841_v48, %v840_v35  ;;  %v929_v55 = vadd.f32 %v928_v49, %v927_v37 }
 0x119   :  { %v801_v56 = vmul.f32 %v1452_v43, %v730_v41  ;;  %v1143_v57 = vpop.f32.mrb[22].mxu0  ;;  %v1175_v58 = vpop.f32.mrb[22].mxu1  ;;  %v696_v59 = vmax.f32 %v490_v42, 0.0  ;;  %v728_v60 = vmax.f32 %v618_v44, 0.0  ;;  %v699_v61 = vmax.f32 %v501_v45, 0.0 }
 0x11a   :  { %v731_v62 = vmax.f32 %v629_v50, 0.0  ;;  %v1553_v63 = vpop.f32.mrb[23].mxu0  ;;  %v1555_v0 = vpop.f32.mrb[23].mxu1  ;;  %v845_v1 = vsel %vm815_vm2, %v766_v27, 0.0  ;;  %v932_v2 = vsel %vm815_vm2, %v798_v28, 0.0  ;;  %v844_v3 = vadd.f32 %v843_v53, %v842_v54 }
 0x11b   :  { %v931_v4 = vadd.f32 %v930_v24, %v929_v55  ;;  %v769_v5 = vmul.f32 %v1452_v43, %v698_v40  ;;  %v938_v6 = vsel %vm815_vm2, %v801_v56, 0.0  ;;  %v767_v7 = vmul.f32 %v1452_v43, %v696_v59 }
 0x11c   :  { %v799_v8 = vmul.f32 %v1452_v43, %v728_v60  ;;  %v846_v9 = vadd.f32 %v845_v1, %v844_v3  ;;  %v493_v11 = vadd.f32 %v1445_v36, %v492_v21  ;;  %v621_v12 = vadd.f32 %v1445_v36, %v620_v22 }
 0x11d   :  { %v933_v10 = vadd.f32 %v932_v2, %v931_v4  ;;  %v847_v13 = vsel %vm815_vm2, %v767_v7, 0.0  ;;  %v770_v15 = vmul.f32 %v1452_v43, %v699_v61  ;;  %v802_v16 = vmul.f32 %v1452_v43, %v731_v62 }
 0x11e   :  { %v934_v14 = vsel %vm815_vm2, %v799_v8, 0.0  ;;  %v848_v17 = vadd.f32 %v847_v13, %v846_v9  ;;  %v697_v19 = vmax.f32 %v493_v11, 0.0  ;;  %v729_v20 = vmax.f32 %v621_v12, 0.0 }
 0x11f   :  { %v935_v18 = vadd.f32 %v934_v14, %v933_v10  ;;  %v1146_v23 = vpop.f32.mrb[24].mxu0  ;;  %v1178_v24 = vpop.f32.mrb[24].mxu1  ;;  %v514_v25 = vadd.f32 %v1142_v46, %v1445_v36  ;;  %v642_v21 = vadd.f32 %v1174_v47, %v1445_v36  ;;  %v506_v22 = vadd.f32 %v1445_v36, %v505_v51 }
 0x120   :  { %v634_v26 = vadd.f32 %v1445_v36, %v633_v52  ;;  %v521_v29 = vpop.f32.mrb[25].mxu0  ;;  %v649_v30 = vpop.f32.mrb[25].mxu1  ;;  %v768_v31 = vmul.f32 %v1452_v43, %v697_v19  ;;  %v800_v32 = vmul.f32 %v1452_v43, %v729_v20  ;;  %v517_v27 = vadd.f32 %v1143_v57, %v1445_v36 }
 0x121   :  { %v645_v28 = vadd.f32 %v1175_v58, %v1445_v36  ;;  %v1147_v33 = vpop.f32.mrb[26].mxu0  ;;  %v1179_v34 = vpop.f32.mrb[26].mxu1  ;;  %v702_v35 = vmax.f32 %v514_v25, 0.0  ;;  %v734_v37 = vmax.f32 %v642_v21, 0.0  ;;  %v700_v38 = vmax.f32 %v506_v22, 0.0 }
 0x122   :  { %v732_v39 = vmax.f32 %v634_v26, 0.0  ;;  %v1577_v40 = vpop.f32.mrb[27].mxu0  ;;  %v1579_v41 = vpop.f32.mrb[27].mxu1  ;;  %v849_v42 = vsel %vm815_vm2, %v768_v31, 0.0  ;;  %v936_v44 = vsel %vm815_vm2, %v800_v32, 0.0  ;;  %v703_v46 = vmax.f32 %v517_v27, 0.0 }
 0x123   :  { %v735_v47 = vmax.f32 %v645_v28, 0.0  ;;  %v851_v48 = vsel %vm815_vm2, %v769_v5, 0.0  ;;  %v850_v49 = vadd.f32 %v849_v42, %v848_v17  ;;  %v937_v45 = vadd.f32 %v936_v44, %v935_v18 }
 0x124   :  { %v853_v50 = vsel %vm815_vm2, %v770_v15, 0.0  ;;  %v940_v51 = vsel %vm815_vm2, %v802_v16, 0.0  ;;  %v771_v52 = vmul.f32 %v1452_v43, %v700_v38  ;;  %v803_v53 = vmul.f32 %v1452_v43, %v732_v39 }
 0x125   :  { %v852_v54 = vadd.f32 %v851_v48, %v850_v49  ;;  %v939_v55 = vadd.f32 %v938_v6, %v937_v45  ;;  %v773_v56 = vmul.f32 %v1452_v43, %v702_v35  ;;  %v805_v57 = vmul.f32 %v1452_v43, %v734_v37 }
 0x126   :  { %v855_v58 = vsel %vm815_vm2, %v771_v52, 0.0  ;;  %v942_v59 = vsel %vm815_vm2, %v803_v53, 0.0  ;;  %v774_v60 = vmul.f32 %v1452_v43, %v703_v46  ;;  %v806_v61 = vmul.f32 %v1452_v43, %v735_v47 }
 0x127   :  { %v1150_v62 = vpop.f32.mrb[28].mxu0  ;;  %v1182_v1 = vpop.f32.mrb[28].mxu1  ;;  %v854_v2 = vadd.f32 %v853_v50, %v852_v54  ;;  %v941_v3 = vadd.f32 %v940_v51, %v939_v55  ;;  %v509_v4 = vadd.f32 %v1445_v36, %v1553_v63  ;;  %v637_v5 = vadd.f32 %v1445_v36, %v1555_v0 }
 0x128   :  { %v537_v6 = vpop.f32.mrb[29].mxu0  ;;  %v665_v7 = vpop.f32.mrb[29].mxu1  ;;  %v530_v8 = vadd.f32 %v1146_v23, %v1445_v36  ;;  %v658_v9 = vadd.f32 %v1178_v24, %v1445_v36  ;;  %v522_v10 = vadd.f32 %v1445_v36, %v521_v29  ;;  %v650_v11 = vadd.f32 %v1445_v36, %v649_v30 }
 0x129   :  { %v1151_v12 = vpop.f32.mrb[30].mxu0  ;;  %v1183_v13 = vpop.f32.mrb[30].mxu1  ;;  %v856_v14 = vadd.f32 %v855_v58, %v854_v2  ;;  %v943_v15 = vadd.f32 %v942_v59, %v941_v3  ;;  %v701_v16 = vmax.f32 %v509_v4, 0.0  ;;  %v733_v17 = vmax.f32 %v637_v5, 0.0 }
 0x12a   :  { %v1602_v63 = vpop.f32.mrb[31].mxu0  ;;  %v1604_v18 = vpop.f32.mrb[31].mxu1  ;;  %v706_v0 = vmax.f32 %v530_v8, 0.0  ;;  %v738_v19 = vmax.f32 %v658_v9, 0.0  ;;  %v704_v20 = vmax.f32 %v522_v10, 0.0  ;;  %v736_v23 = vmax.f32 %v650_v11, 0.0 }
 0x12b   :  { %v772_v24 = vmul.f32 %v1452_v43, %v701_v16  ;;  %v804_v25 = vmul.f32 %v1452_v43, %v733_v17  ;;  %v533_v21 = vadd.f32 %v1147_v33, %v1445_v36  ;;  %v661_v22 = vadd.f32 %v1179_v34, %v1445_v36 }
 0x12c   :  { %v946_v26 = vsel %vm815_vm2, %v805_v57, 0.0  ;;  %v777_v29 = vmul.f32 %v1452_v43, %v706_v0  ;;  %v775_v30 = vmul.f32 %v1452_v43, %v704_v20  ;;  %v807_v31 = vmul.f32 %v1452_v43, %v736_v23 }
 0x12d   :  { %v857_v32 = vsel %vm815_vm2, %v772_v24, 0.0  ;;  %v944_v27 = vsel %vm815_vm2, %v804_v25, 0.0  ;;  %v707_v28 = vmax.f32 %v533_v21, 0.0  ;;  %v739_v35 = vmax.f32 %v661_v22, 0.0 }
 0x12e   :  { %v859_v37 = vsel %vm815_vm2, %v773_v56, 0.0  ;;  %v861_v33 = vsel %vm815_vm2, %v774_v60, 0.0  ;;  %v858_v38 = vadd.f32 %v857_v32, %v856_v14  ;;  %v945_v34 = vadd.f32 %v944_v27, %v943_v15 }
 0x12f   :  { %v948_v39 = vsel %vm815_vm2, %v806_v61, 0.0  ;;  %v867_v42 = vsel %vm815_vm2, %v777_v29, 0.0  ;;  %v809_v44 = vmul.f32 %v1452_v43, %v738_v19  ;;  %v863_v46 = vsel %vm815_vm2, %v775_v30, 0.0 }
 0x130   :  { %v860_v47 = vadd.f32 %v859_v37, %v858_v38  ;;  %v947_v48 = vadd.f32 %v946_v26, %v945_v34  ;;  %v525_v49 = vadd.f32 %v1445_v36, %v1577_v40  ;;  %v653_v45 = vadd.f32 %v1445_v36, %v1579_v41 }
 0x131   :  { %v950_v50 = vsel %vm815_vm2, %v807_v31, 0.0  ;;  %v778_v51 = vmul.f32 %v1452_v43, %v707_v28  ;;  %v810_v52 = vmul.f32 %v1452_v43, %v739_v35  ;;  %v674_v53 = vadd.f32 %v1182_v1, %v1445_v36 }
 0x132   :  { %v862_v54 = vadd.f32 %v861_v33, %v860_v47  ;;  %v949_v55 = vadd.f32 %v948_v39, %v947_v48  ;;  %v705_v56 = vmax.f32 %v525_v49, 0.0  ;;  %v737_v57 = vmax.f32 %v653_v45, 0.0 }
 0x133   :  { %v546_v58 = vadd.f32 %v1150_v62, %v1445_v36  ;;  %v742_v59 = vmax.f32 %v674_v53, 0.0  ;;  %v538_v40 = vadd.f32 %v1445_v36, %v537_v6  ;;  %v666_v60 = vadd.f32 %v1445_v36, %v665_v7 }
 0x134   :  { %v864_v41 = vadd.f32 %v863_v46, %v862_v54  ;;  %v951_v61 = vadd.f32 %v950_v50, %v949_v55  ;;  %v776_v2 = vmul.f32 %v1452_v43, %v705_v56  ;;  %v808_v3 = vmul.f32 %v1452_v43, %v737_v57 }
 0x135   :  { %v954_v4 = vsel %vm815_vm2, %v809_v44, 0.0  ;;  %v869_v1 = vsel %vm815_vm2, %v778_v51, 0.0  ;;  %v708_v5 = vmax.f32 %v538_v40, 0.0  ;;  %v740_v8 = vmax.f32 %v666_v60, 0.0 }
 0x136   :  { %v865_v9 = vsel %vm815_vm2, %v776_v2, 0.0  ;;  %v952_v62 = vsel %vm815_vm2, %v808_v3, 0.0  ;;  %v549_v6 = vadd.f32 %v1151_v12, %v1445_v36  ;;  %v677_v7 = vadd.f32 %v1183_v13, %v1445_v36 }
 0x137   :  { %v956_v10 = vsel %vm815_vm2, %v810_v52, 0.0  ;;  %v866_v11 = vadd.f32 %v865_v9, %v864_v41  ;;  %v953_v14 = vadd.f32 %v952_v62, %v951_v61  ;;  %v710_v15 = vmax.f32 %v546_v58, 0.0 }
 0x138   :  { %v813_v16 = vmul.f32 %v1452_v43, %v742_v59  ;;  %v779_v17 = vmul.f32 %v1452_v43, %v708_v5  ;;  %v811_v0 = vmul.f32 %v1452_v43, %v740_v8  ;;  %v743_v19 = vmax.f32 %v677_v7, 0.0 }
 0x139   :  { %v868_v20 = vadd.f32 %v867_v42, %v866_v11  ;;  %v955_v23 = vadd.f32 %v954_v4, %v953_v14  ;;  %v541_v24 = vadd.f32 %v1445_v36, %v1602_v63  ;;  %v669_v12 = vadd.f32 %v1445_v36, %v1604_v18 }
 0x13a   :  { %v871_v13 = vsel %vm815_vm2, %v779_v17, 0.0  ;;  %v958_v25 = vsel %vm815_vm2, %v811_v0, 0.0  ;;  %v711_v21 = vmax.f32 %v549_v6, 0.0  ;;  %v814_v22 = vmul.f32 %v1452_v43, %v743_v19 }
 0x13b   :  { %v870_v26 = vadd.f32 %v869_v1, %v868_v20  ;;  %v957_v29 = vadd.f32 %v956_v10, %v955_v23  ;;  %v709_v30 = vmax.f32 %v541_v24, 0.0  ;;  %v741_v31 = vmax.f32 %v669_v12, 0.0 }
 0x13c   :  { %v781_v32 = vmul.f32 %v1452_v43, %v710_v15  ;;  %v962_v36 = vsel %vm815_vm2, %v813_v16, 0.0  ;;  %v782_v18 = vmul.f32 %v1452_v43, %v711_v21  ;;  %v964_v47 = vsel %vm815_vm2, %v814_v22, 0.0 }
 0x13d   :  { %v872_v27 = vadd.f32 %v871_v13, %v870_v26  ;;  %v959_v28 = vadd.f32 %v958_v25, %v957_v29  ;;  %v780_v63 = vmul.f32 %v1452_v43, %v709_v30  ;;  %v812_v35 = vmul.f32 %v1452_v43, %v741_v31 }
 0x13e   :  { %v875_v39 = vsel %vm815_vm2, %v781_v32, 0.0  ;;  %v877_v46 = vsel %vm815_vm2, %v782_v18, 0.0  ;;  %v890_v41 = vstv %s1683_s4  ;;  %v899_v14 = vstv %s898_s3 }
 0x13f   :  { %v873_v37 = vsel %vm815_vm2, %v780_v63, 0.0  ;;  %v960_v33 = vsel %vm815_vm2, %v812_v35, 0.0  ;;  %v984_v15 = vstv %s1078_s22 }
 0x140   :  { %v874_v38 = vadd.f32 %v873_v37, %v872_v27  ;;  %v961_v34 = vadd.f32 %v960_v33, %v959_v28 }
 0x142   :  { %v876_v42 = vadd.f32 %v875_v39, %v874_v38  ;;  %v963_v44 = vadd.f32 %v962_v36, %v961_v34 }
 0x144   :  { %v878_v48 = vadd.f32 %v877_v46, %v876_v42  ;;  %v965_v49 = vadd.f32 %v964_v47, %v963_v44 }
 0x146   :  { %v879_v45 = vrot.slane %v878_v48, 4  ;;  %v966_v50 = vrot.slane %v965_v49, 4 }
 0x148   :  { %v880_v51 = vadd.f32 %v879_v45, %v878_v48  ;;  %v967_v43 = vadd.f32 %v966_v50, %v965_v49 }
 0x14a   :  { %v881_v52 = vrot.slane %v880_v51, 2  ;;  %v968_v53 = vrot.slane %v967_v43, 2 }
 0x14c   :  { %v882_v54 = vadd.f32 %v881_v52, %v880_v51  ;;  %v969_v55 = vadd.f32 %v968_v53, %v967_v43 }
 0x14e   :  { %v883_v56 = vrot.slane %v882_v54, 1  ;;  %v970_v57 = vrot.slane %v969_v55, 1 }
 0x150   :  { %v884_v58 = vadd.f32 %v883_v56, %v882_v54  ;;  %v971_v40 = vadd.f32 %v970_v57, %v969_v55 }
 0x152   :  { %v885_v59 = vsel %vm815_vm2, %v884_v58, 0.0  ;;  %v972_v60 = vsel %vm815_vm2, %v971_v40, 0.0 }
 0x153   :  { %886 = vadd.xlane.f32.xlu0 %v885_v59 }
 0x157   :  { %973 = vadd.xlane.f32.xlu0 %v972_v60 }
 0x1e0   :  { %v887_v61 = vpop.xlane.xlu0 %886 }
 0x1e1   :  { %v888_v2 = vmul.f32 0.00390625, %v887_v61 }
 0x1e3   :  { %v891_v3 = vadd.f32 %v890_v41, %v888_v2 }
 0x1e4   :  { %v974_v4 = vpop.xlane.xlu0 %973 }
 0x1e5   :  { %v1076_v1 = vmul.f32 -1.442695, %v891_v3  ;;  %v975_v5 = vmul.f32 0.00390625, %v974_v4 }
 0x1e7   :  { %1231 = vpow2.f32 %v1076_v1  ;;  %v976_v8 = vadd.f32 %v975_v5, %v890_v41 }
 0x1e9   :  { %v1077_v9 = vmul.f32 -1.442695, %v976_v8 }
 0x1eb   :  { %1233 = vpow2.f32 %v1077_v9 }
 0x1f1   :  { %v1232_v62 = vpop.eup %1231 }
 0x1f2   :  { %v895_v6 = vadd.f32 1.0, %v1232_v62 }
 0x1f4   :  { %1235 = vrcp.f32 %v895_v6 }
 0x1f5   :  { %v1234_v7 = vpop.eup %1233 }
 0x1f6   :  { %v980_v10 = vadd.f32 1.0, %v1234_v7 }
 0x1f8   :  { %1237 = vrcp.f32 %v980_v10 }
 0x1fe   :  { %v1236_v11 = vpop.eup %1235 }
 0x1ff   :  { %v900_v16 = vsub.f32 %v1236_v11, %v899_v14 }
 0x201   :  { %v901_v19 = vand.u32 2147483647, %v900_v16 }
 0x202   :  { %v1238_v17 = vpop.eup %1237 }
 0x203   :  { %v985_v0 = vsub.f32 %v1238_v17, %v984_v15 }
 0x205   :  { %v986_v20 = vand.u32 2147483647, %v985_v0 }
 0x207   :  { %v987_v23 = vadd.f32 %v986_v20, %v901_v19 }
 0x209   :  { %1192 = vpush %v987_v23 }
 0x23a   :  { %s1193_s4 = spop %1192 }
 0x23b   :  { %s990_s23 = smul.f32 0.5, %s1193_s4 }
 0x23d   :  { %992 = sst [smem:[#allocation6]] %s990_s23 }
 0x23e   :  { %1260 = shalt.err (!%p1257_p7)
}
 0x23f   :  { %s1266_s30 = smov [#allocation6]  }
 0x240   :  { %1000 = dma.smem_to_hbm %s1266_s30, 16, %s1685_s6, [#allocation4]  }
 0x241   :  { %1263 = dma.done.wait [#allocation4], 16  }
 0x242   :  { %1264 = vsyncadd [#allocation4], 4294967280 }
 0x243   :  { %1004 = sfence }
 0x244   :  { %1005 = vsyncpa [#allocation4], 1 }
 0x245   :  { %1006 = vsyncpa [#allocation5], 1 }

</bundles_post_ra>
